<compile_context>
chip_gen: v6e
topology: v6e:2x2x1
jax: 0.10.0
libtpu: 0.0.40
codegen_flags: <defaults>
</compile_context>

<pallas_src>
import functools

import jax
import jax.numpy as jnp
from jax import lax
from jax.experimental import pallas as pl
from jax.experimental.pallas import tpu as pltpu

LANES = 128
MAX_TILE_ROWS = 2048      # (2048, 128) f32 tile = 1 MiB
NUM_PARTS = 2             # leading "parallel" grid axis (both v7x TensorCores)


def _dice_sums_kernel(fake_ref, real_ref, out_ref,
                      acc_inter, acc_fake, acc_real,
                      *, alpha, n_valid, tile_rows, t_half, t_total):
    p = pl.program_id(0)           # parallel slice (TensorCore on v7x)
    j = pl.program_id(1)           # tile index within the slice
    t = p * t_half + j             # global (unclamped) tile index

    @pl.when(j == 0)
    def _init():
        acc_inter[...] = jnp.zeros_like(acc_inter)
        acc_fake[...] = jnp.zeros_like(acc_fake)
        acc_real[...] = jnp.zeros_like(acc_real)

    # Upcast in-kernel; HBM traffic stays in the native input dtype.
    fake = fake_ref[...].astype(jnp.float32)
    real = real_ref[...].astype(jnp.float32)

    # sigmoid(alpha*x) = 1 / (1 + exp(-alpha*x)); exp + approx reciprocal (EUP).
    e = jnp.exp((-alpha) * fake)
    sig = pl.reciprocal(1.0 + e, approx=True)
    inter = sig * real

    # Only the globally-last valid tile (and fully out-of-range overflow tiles
    # of the second slice) can contain invalid / padded elements.
    is_edge = t >= (t_total - 1)

    @pl.when(jnp.logical_not(is_edge))
    def _accumulate_full():
        acc_inter[...] += inter
        acc_fake[...] += sig
        acc_real[...] += real

    @pl.when(is_edge)
    def _accumulate_masked():
        row = lax.broadcasted_iota(jnp.int32, (tile_rows, LANES), 0)
        col = lax.broadcasted_iota(jnp.int32, (tile_rows, LANES), 1)
        gidx = (t * tile_rows + row) * LANES + col     # global flat index
        valid = gidx < n_valid
        zero = jnp.zeros_like(sig)
        acc_inter[...] += jnp.where(valid, inter, zero)
        acc_fake[...] += jnp.where(valid, sig, zero)
        acc_real[...] += jnp.where(valid, real, zero)

    @pl.when(j == pl.num_programs(1) - 1)
    def _finalize():
        s_inter = jnp.sum(acc_inter[...])
        s_fake = jnp.sum(acc_fake[...])
        s_real = jnp.sum(acc_real[...])
        sub = lax.broadcasted_iota(jnp.int32, (1, 8, LANES), 1)
        out_ref[...] = jnp.where(sub == 0, s_inter,
                                 jnp.where(sub == 1, s_fake,
                                           jnp.where(sub == 2, s_real, 0.0)))


def dice_loss(fake, real, alpha: float = 10.0, smooth: float = 1.0):
    assert fake.shape == real.shape
    n = int(fake.size)

    fake_flat = fake.reshape(-1)
    real_flat = real.reshape(-1)

    rem = n % LANES
    if rem:
        # Rare fallback: pad only up to the next lane multiple (< 128 elems).
        pad = LANES - rem
        fake_flat = jnp.pad(fake_flat, (0, pad))
        real_flat = jnp.pad(real_flat, (0, pad))
    rows = fake_flat.size // LANES

    fake2d = fake_flat.reshape(rows, LANES)   # free reshape (no copy)
    real2d = real_flat.reshape(rows, LANES)

    tile_rows = rows if rows < MAX_TILE_ROWS else MAX_TILE_ROWS
    t_total = (rows + tile_rows - 1) // tile_rows       # number of valid tiles
    t_half = (t_total + NUM_PARTS - 1) // NUM_PARTS     # tiles per slice

    def in_map(p, j):
        # Clamp so the overflow step of the second slice never indexes past the
        # array; its contribution is zeroed in-kernel via the index mask.
        return (jnp.minimum(p * t_half + j, t_total - 1), 0)

    in_spec = pl.BlockSpec((tile_rows, LANES), in_map)
    out_spec = pl.BlockSpec((1, 8, LANES), lambda p, j: (p, 0, 0))

    kernel = functools.partial(
        _dice_sums_kernel,
        alpha=float(alpha), n_valid=n,
        tile_rows=tile_rows, t_half=t_half, t_total=t_total)

    partials = pl.pallas_call(
        kernel,
        out_shape=jax.ShapeDtypeStruct((NUM_PARTS, 8, LANES), jnp.float32),
        grid_spec=pltpu.PrefetchScalarGridSpec(
            num_scalar_prefetch=0,
            grid=(NUM_PARTS, t_half),
            in_specs=[in_spec, in_spec],
            out_specs=out_spec,
            scratch_shapes=[pltpu.VMEM((tile_rows, LANES), jnp.float32)] * 3,
        ),
        compiler_params=pltpu.CompilerParams(
            dimension_semantics=("parallel", "arbitrary"),
        ),
    )(fake2d, real2d)

    sums = jnp.sum(partials[:, :3, 0], axis=0)   # [inter_sum, fake_sum, real_sum]
    intersection = sums[0] + smooth
    union = sums[1] + sums[2] + smooth
    dice = 2.0 * intersection / union
    return 1.0 - dice


def _reference(fake, real, alpha=10.0, smooth=1.0):
    f = fake.astype(jnp.float32)
    r = real.astype(jnp.float32)
    sig = 1.0 / (1.0 + jnp.exp(-alpha * f))
    intersection = jnp.sum(sig * r) + smooth
    union = jnp.sum(sig) + jnp.sum(r) + smooth
    return 1.0 - 2.0 * intersection / union


if __name__ == "__main__":
    key = jax.random.PRNGKey(0)
    k1, k2 = jax.random.split(key)
    # NCHW inputs, as the PyTorch module would receive (generator logits / mask).
    fake = jax.random.normal(k1, (2, 4, 16, 16), dtype=jnp.float32)
    real = (jax.random.uniform(k2, (2, 4, 16, 16)) > 0.5).astype(jnp.float32)

    loss = dice_loss(fake, real, alpha=10.0, smooth=1.0)
    loss = jax.block_until_ready(loss)

    ref = _reference(fake, real, alpha=10.0, smooth=1.0)
    assert jnp.allclose(loss, ref, atol=2e-3, rtol=2e-3), (loss, ref)
    print("KERNEL_OK")
</pallas_src>

<mosaic_0001>
module attributes {stable_mosaic.version = 11 : i64} {
  func.func @_dice_sums_kernel(%arg0: i32, %arg1: i32, %arg2: memref<16x128xf32, #tpu.memory_space<vmem>>, %arg3: memref<16x128xf32, #tpu.memory_space<vmem>>, %arg4: memref<1x8x128xf32, #tpu.memory_space<vmem>>, %arg5: memref<16x128xf32, #tpu.memory_space<vmem>>, %arg6: memref<16x128xf32, #tpu.memory_space<vmem>>, %arg7: memref<16x128xf32, #tpu.memory_space<vmem>>) attributes {dimension_semantics = [#tpu.dimension_semantics<parallel>, #tpu.dimension_semantics<arbitrary>], iteration_bounds = array<i64: 2, 1>, scalar_prefetch = 0 : i64, scratch_operands = 3 : i64, tpu.core_type = #tpu.core_type<tc>, window_params = [{transform_indices = @transform_0, window_bounds = array<i64: 16, 128>}, {transform_indices = @transform_1, window_bounds = array<i64: 16, 128>}, {transform_indices = @transform_2, window_bounds = array<i64: 1, 8, 128>}]} {
    %c1_i32 = arith.constant 1 : i32
    %0 = arith.muli %arg0, %c1_i32 : i32
    %1 = arith.addi %0, %arg1 : i32
    %c0_i32 = arith.constant 0 : i32
    %2 = arith.cmpi eq, %arg1, %c0_i32 : i32
    %3 = arith.extui %2 : i1 to i32
    %c0_i32_0 = arith.constant 0 : i32
    %4 = arith.cmpi ne, %3, %c0_i32_0 : i32
    scf.if %4 {
      %cst_10 = arith.constant 0.000000e+00 : f32
      %23 = vector.broadcast %cst_10 : f32 to vector<16x128xf32>
      %c0_11 = arith.constant 0 : index
      %c0_12 = arith.constant 0 : index
      %24 = vector.load %arg5[%c0_11, %c0_12] : memref<16x128xf32, #tpu.memory_space<vmem>>, vector<16x128xf32>
      tpu.vector_store %arg5[%c0_11, %c0_12], %23 {strides = array<i32>} : memref<16x128xf32, #tpu.memory_space<vmem>>, vector<16x128xf32>,
      %cst_13 = arith.constant 0.000000e+00 : f32
      %25 = vector.broadcast %cst_13 : f32 to vector<16x128xf32>
      %c0_14 = arith.constant 0 : index
      %c0_15 = arith.constant 0 : index
      %26 = vector.load %arg6[%c0_14, %c0_15] : memref<16x128xf32, #tpu.memory_space<vmem>>, vector<16x128xf32>
      tpu.vector_store %arg6[%c0_14, %c0_15], %25 {strides = array<i32>} : memref<16x128xf32, #tpu.memory_space<vmem>>, vector<16x128xf32>,
      %cst_16 = arith.constant 0.000000e+00 : f32
      %27 = vector.broadcast %cst_16 : f32 to vector<16x128xf32>
      %c0_17 = arith.constant 0 : index
      %c0_18 = arith.constant 0 : index
      %28 = vector.load %arg7[%c0_17, %c0_18] : memref<16x128xf32, #tpu.memory_space<vmem>>, vector<16x128xf32>
      tpu.vector_store %arg7[%c0_17, %c0_18], %27 {strides = array<i32>} : memref<16x128xf32, #tpu.memory_space<vmem>>, vector<16x128xf32>,
    } else {
    }
    %c0 = arith.constant 0 : index
    %c0_1 = arith.constant 0 : index
    %5 = vector.load %arg2[%c0, %c0_1] : memref<16x128xf32, #tpu.memory_space<vmem>>, vector<16x128xf32>
    %c0_2 = arith.constant 0 : index
    %c0_3 = arith.constant 0 : index
    %6 = vector.load %arg3[%c0_2, %c0_3] : memref<16x128xf32, #tpu.memory_space<vmem>>, vector<16x128xf32>
    %cst = arith.constant -1.000000e+01 : f32
    %7 = vector.broadcast %cst : f32 to vector<16x128xf32>
    %8 = arith.mulf %7, %5 : vector<16x128xf32>
    %9 = math.exp %8 : vector<16x128xf32>
    %cst_4 = arith.constant 1.000000e+00 : f32
    %10 = vector.broadcast %cst_4 : f32 to vector<16x128xf32>
    %11 = arith.addf %10, %9 : vector<16x128xf32>
    %12 = tpu.reciprocal %11 {approx = true} : vector<16x128xf32> -> vector<16x128xf32>
    %13 = arith.mulf %12, %6 : vector<16x128xf32>
    %c0_i32_5 = arith.constant 0 : i32
    %14 = arith.cmpi sge, %1, %c0_i32_5 : i32
    %true = arith.constant true
    %15 = arith.xori %14, %true : i1
    %16 = arith.extui %15 : i1 to i32
    %c0_i32_6 = arith.constant 0 : i32
    %17 = arith.cmpi ne, %16, %c0_i32_6 : i32
    scf.if %17 {
      %c0_10 = arith.constant 0 : index
      %c0_11 = arith.constant 0 : index
      %23 = vector.load %arg5[%c0_10, %c0_11] : memref<16x128xf32, #tpu.memory_space<vmem>>, vector<16x128xf32>
      %24 = arith.addf %23, %13 : vector<16x128xf32>
      %c0_12 = arith.constant 0 : index
      %c0_13 = arith.constant 0 : index
      %25 = vector.load %arg5[%c0_12, %c0_13] : memref<16x128xf32, #tpu.memory_space<vmem>>, vector<16x128xf32>
      tpu.vector_store %arg5[%c0_12, %c0_13], %24 {strides = array<i32>} : memref<16x128xf32, #tpu.memory_space<vmem>>, vector<16x128xf32>,
      %c0_14 = arith.constant 0 : index
      %c0_15 = arith.constant 0 : index
      %26 = vector.load %arg6[%c0_14, %c0_15] : memref<16x128xf32, #tpu.memory_space<vmem>>, vector<16x128xf32>
      %27 = arith.addf %26, %12 : vector<16x128xf32>
      %c0_16 = arith.constant 0 : index
      %c0_17 = arith.constant 0 : index
      %28 = vector.load %arg6[%c0_16, %c0_17] : memref<16x128xf32, #tpu.memory_space<vmem>>, vector<16x128xf32>
      tpu.vector_store %arg6[%c0_16, %c0_17], %27 {strides = array<i32>} : memref<16x128xf32, #tpu.memory_space<vmem>>, vector<16x128xf32>,
      %c0_18 = arith.constant 0 : index
      %c0_19 = arith.constant 0 : index
      %29 = vector.load %arg7[%c0_18, %c0_19] : memref<16x128xf32, #tpu.memory_space<vmem>>, vector<16x128xf32>
      %30 = arith.addf %29, %6 : vector<16x128xf32>
      %c0_20 = arith.constant 0 : index
      %c0_21 = arith.constant 0 : index
      %31 = vector.load %arg7[%c0_20, %c0_21] : memref<16x128xf32, #tpu.memory_space<vmem>>, vector<16x128xf32>
      tpu.vector_store %arg7[%c0_20, %c0_21], %30 {strides = array<i32>} : memref<16x128xf32, #tpu.memory_space<vmem>>, vector<16x128xf32>,
    } else {
    }
    %18 = arith.extui %14 : i1 to i32
    %c0_i32_7 = arith.constant 0 : i32
    %19 = arith.cmpi ne, %18, %c0_i32_7 : i32
    scf.if %19 {
      %23 = tpu.iota {dimensions = array<i32: 0>} : vector<16x128xi32>
      %24 = tpu.iota {dimensions = array<i32: 1>} : vector<16x128xi32>
      %c16_i32 = arith.constant 16 : i32
      %25 = arith.muli %1, %c16_i32 : i32
      %26 = vector.broadcast %25 : i32 to vector<16x128xi32>
      %27 = arith.addi %26, %23 : vector<16x128xi32>
      %c128_i32 = arith.constant 128 : i32
      %28 = vector.broadcast %c128_i32 : i32 to vector<16x128xi32>
      %29 = arith.muli %27, %28 : vector<16x128xi32>
      %30 = arith.addi %29, %24 : vector<16x128xi32>
      %c2048_i32 = arith.constant 2048 : i32
      %31 = vector.broadcast %c2048_i32 : i32 to vector<16x128xi32>
      %32 = arith.cmpi slt, %30, %31 : vector<16x128xi32>
      %cst_10 = arith.constant 0.000000e+00 : f32
      %33 = vector.broadcast %cst_10 : f32 to vector<16x128xf32>
      %c0_11 = arith.constant 0 : index
      %c0_12 = arith.constant 0 : index
      %34 = vector.load %arg5[%c0_11, %c0_12] : memref<16x128xf32, #tpu.memory_space<vmem>>, vector<16x128xf32>
      %35 = arith.select %32, %13, %33 : vector<16x128xi1>, vector<16x128xf32>
      %36 = arith.addf %34, %35 : vector<16x128xf32>
      %c0_13 = arith.constant 0 : index
      %c0_14 = arith.constant 0 : index
      %37 = vector.load %arg5[%c0_13, %c0_14] : memref<16x128xf32, #tpu.memory_space<vmem>>, vector<16x128xf32>
      tpu.vector_store %arg5[%c0_13, %c0_14], %36 {strides = array<i32>} : memref<16x128xf32, #tpu.memory_space<vmem>>, vector<16x128xf32>,
      %c0_15 = arith.constant 0 : index
      %c0_16 = arith.constant 0 : index
      %38 = vector.load %arg6[%c0_15, %c0_16] : memref<16x128xf32, #tpu.memory_space<vmem>>, vector<16x128xf32>
      %39 = arith.select %32, %12, %33 : vector<16x128xi1>, vector<16x128xf32>
      %40 = arith.addf %38, %39 : vector<16x128xf32>
      %c0_17 = arith.constant 0 : index
      %c0_18 = arith.constant 0 : index
      %41 = vector.load %arg6[%c0_17, %c0_18] : memref<16x128xf32, #tpu.memory_space<vmem>>, vector<16x128xf32>
      tpu.vector_store %arg6[%c0_17, %c0_18], %40 {strides = array<i32>} : memref<16x128xf32, #tpu.memory_space<vmem>>, vector<16x128xf32>,
      %c0_19 = arith.constant 0 : index
      %c0_20 = arith.constant 0 : index
      %42 = vector.load %arg7[%c0_19, %c0_20] : memref<16x128xf32, #tpu.memory_space<vmem>>, vector<16x128xf32>
      %43 = arith.select %32, %6, %33 : vector<16x128xi1>, vector<16x128xf32>
      %44 = arith.addf %42, %43 : vector<16x128xf32>
      %c0_21 = arith.constant 0 : index
      %c0_22 = arith.constant 0 : index
      %45 = vector.load %arg7[%c0_21, %c0_22] : memref<16x128xf32, #tpu.memory_space<vmem>>, vector<16x128xf32>
      tpu.vector_store %arg7[%c0_21, %c0_22], %44 {strides = array<i32>} : memref<16x128xf32, #tpu.memory_space<vmem>>, vector<16x128xf32>,
    } else {
    }
    %c0_i32_8 = arith.constant 0 : i32
    %20 = arith.cmpi eq, %arg1, %c0_i32_8 : i32
    %21 = arith.extui %20 : i1 to i32
    %c0_i32_9 = arith.constant 0 : i32
    %22 = arith.cmpi ne, %21, %c0_i32_9 : i32
    scf.if %22 {
      %c0_10 = arith.constant 0 : index
      %c0_11 = arith.constant 0 : index
      %23 = vector.load %arg5[%c0_10, %c0_11] : memref<16x128xf32, #tpu.memory_space<vmem>>, vector<16x128xf32>
      %24 = vector.shape_cast %23 : vector<16x128xf32> to vector<1x16x128xf32>
      %cst_12 = arith.constant dense<0.000000e+00> : vector<1xf32>
      %25 = vector.multi_reduction <add>, %24, %cst_12 [1, 2] : vector<1x16x128xf32> to vector<1xf32>
      %26 = vector.shape_cast %25 : vector<1xf32> to vector<1x1x1xf32>
      %27 = vector.extract %26[0, 0, 0] : f32 from vector<1x1x1xf32>
      %c0_13 = arith.constant 0 : index
      %c0_14 = arith.constant 0 : index
      %28 = vector.load %arg6[%c0_13, %c0_14] : memref<16x128xf32, #tpu.memory_space<vmem>>, vector<16x128xf32>
      %29 = vector.shape_cast %28 : vector<16x128xf32> to vector<1x16x128xf32>
      %cst_15 = arith.constant dense<0.000000e+00> : vector<1xf32>
      %30 = vector.multi_reduction <add>, %29, %cst_15 [1, 2] : vector<1x16x128xf32> to vector<1xf32>
      %31 = vector.shape_cast %30 : vector<1xf32> to vector<1x1x1xf32>
      %32 = vector.extract %31[0, 0, 0] : f32 from vector<1x1x1xf32>
      %c0_16 = arith.constant 0 : index
      %c0_17 = arith.constant 0 : index
      %33 = vector.load %arg7[%c0_16, %c0_17] : memref<16x128xf32, #tpu.memory_space<vmem>>, vector<16x128xf32>
      %34 = vector.shape_cast %33 : vector<16x128xf32> to vector<1x16x128xf32>
      %cst_18 = arith.constant dense<0.000000e+00> : vector<1xf32>
      %35 = vector.multi_reduction <add>, %34, %cst_18 [1, 2] : vector<1x16x128xf32> to vector<1xf32>
      %36 = vector.shape_cast %35 : vector<1xf32> to vector<1x1x1xf32>
      %37 = vector.extract %36[0, 0, 0] : f32 from vector<1x1x1xf32>
      %38 = tpu.iota {dimensions = array<i32: 1>} : vector<1x8x128xi32>
      %c0_i32_19 = arith.constant 0 : i32
      %39 = vector.broadcast %c0_i32_19 : i32 to vector<1x8x128xi32>
      %40 = arith.cmpi eq, %38, %39 : vector<1x8x128xi32>
      %c1_i32_20 = arith.constant 1 : i32
      %41 = vector.broadcast %c1_i32_20 : i32 to vector<1x8x128xi32>
      %42 = arith.cmpi eq, %38, %41 : vector<1x8x128xi32>
      %c2_i32 = arith.constant 2 : i32
      %43 = vector.broadcast %c2_i32 : i32 to vector<1x8x128xi32>
      %44 = arith.cmpi eq, %38, %43 : vector<1x8x128xi32>
      %cst_21 = arith.constant 0.000000e+00 : f32
      %45 = vector.broadcast %37 : f32 to vector<1x8x128xf32>
      %46 = vector.broadcast %cst_21 : f32 to vector<1x8x128xf32>
      %47 = arith.select %44, %45, %46 : vector<1x8x128xi1>, vector<1x8x128xf32>
      %48 = vector.broadcast %32 : f32 to vector<1x8x128xf32>
      %49 = arith.select %42, %48, %47 : vector<1x8x128xi1>, vector<1x8x128xf32>
      %50 = vector.broadcast %27 : f32 to vector<1x8x128xf32>
      %51 = arith.select %40, %50, %49 : vector<1x8x128xi1>, vector<1x8x128xf32>
      %c0_22 = arith.constant 0 : index
      %c0_23 = arith.constant 0 : index
      %c0_24 = arith.constant 0 : index
      %52 = vector.load %arg4[%c0_22, %c0_23, %c0_24] : memref<1x8x128xf32, #tpu.memory_space<vmem>>, vector<1x8x128xf32>
      tpu.vector_store %arg4[%c0_22, %c0_23, %c0_24], %51 {strides = array<i32>} : memref<1x8x128xf32, #tpu.memory_space<vmem>>, vector<1x8x128xf32>,
    } else {
    }
    return
  }
  func.func @transform_0(%arg0: i32, %arg1: i32) -> (i32, i32) {
    %c1_i32 = arith.constant 1 : i32
    %0 = arith.muli %arg0, %c1_i32 : i32
    %1 = arith.addi %0, %arg1 : i32
    %c0_i32 = arith.constant 0 : i32
    %2 = arith.minsi %1, %c0_i32 : i32
    %c0_i32_0 = arith.constant 0 : i32
    %c0_i32_1 = arith.constant 0 : i32
    return %2, %c0_i32_0 : i32, i32
  }
  func.func @transform_1(%arg0: i32, %arg1: i32) -> (i32, i32) {
    %c1_i32 = arith.constant 1 : i32
    %0 = arith.muli %arg0, %c1_i32 : i32
    %1 = arith.addi %0, %arg1 : i32
    %c0_i32 = arith.constant 0 : i32
    %2 = arith.minsi %1, %c0_i32 : i32
    %c0_i32_0 = arith.constant 0 : i32
    %c0_i32_1 = arith.constant 0 : i32
    return %2, %c0_i32_0 : i32, i32
  }
  func.func @transform_2(%arg0: i32, %arg1: i32) -> (i32, i32, i32) {
    %c0_i32 = arith.constant 0 : i32
    %c0_i32_0 = arith.constant 0 : i32
    %c0_i32_1 = arith.constant 0 : i32
    return %arg0, %c0_i32, %c0_i32_0 : i32, i32, i32
  }
}

</mosaic_0001>

<bundles_post_ra>
// kernel: tpu_custom_call.1
= control target key start
LH: loop header
LB: loop body
LE: loop exit
PB: predicated region body
PF: predicated region fallthrough
CT: control target
= control target key end

     0   :  { %7 = vsyncpa [#allocation6], 0  ;;  %s1011_s0 = inlined_call_operand.hbm [shape: f32[16,128], index: 0, kind: input, shape index: {}]   ;;  %s1012_s1 = inlined_call_operand.hbm [shape: f32[16,128], index: 1, kind: input, shape index: {}]   ;;  %s1013_s2 = inlined_call_operand.hbm [shape: f32[2,8,128], index: 2, kind: output, shape index: {}]  }
   0x1   :  { %9 = vsyncpa [#allocation6 + $0x1], 0 }
   0x2   :  { %10 = vsyncpa [#allocation9], 0 }
   0x3   :  { %12 = vsyncpa [#allocation9 + $0x1], 0 }
   0x4   :  { %13 = vsyncpa [#allocation7], 0 }
   0x5   :  { %15 = vsyncpa [#allocation7 + $0x1], 0  ;;  %s813_s9 = smov 0   ;;  %s815_s10 = smov 0  }
   0x6   :  { %s817_s11 = smov 0   ;;  %s819_s12 = smov 0  }
   0x7   :  { %s821_s13 = smov 0   ;;  %s823_s14 = smov 0  }
   0x8   :  { %s825_s15 = smov 0   ;;  %s827_s16 = smov 0  }
   0x9 LB: > { %s498_s17 = sadd.s32 4294967295, %s790_s16   ;;  %s499_s18 = sadd.s32 4294967294, %s790_s16   ;;  %s790_s16 = sphi %s827_s16, %s21_s16   ;;  %s786_s15 = sphi %s825_s15, %s1032_s15   ;;  %s782_s14 = sphi %s823_s14, %s1031_s14   ;;  %s778_s13 = sphi %s821_s13, %s1001_s13   ;;  %s774_s12 = sphi %s819_s12, %s1030_s12   ;;  %s770_s11 = sphi %s817_s11, %s1029_s11   ;;  %s766_s10 = sphi %s815_s10, %s1028_s10   ;;  %s762_s9 = sphi %s813_s9, %s1027_s9  }
   0xa   : > { %s33_s19 = sadd.s32 1, %s786_s15  ;;  %p759_p1 = scmp.ne.s32.totalorder %s778_s13, 0 }
   0xb   : > { %p35_p0 = scmp.ge.s32.totalorder %s33_s19, 2  ;;  %p54_p2 = scmp.eq.s32.totalorder %s790_s16, 0 }
   0xc   : > { %p59_p3 = scmp.ne.s32.totalorder %s778_s13, %s774_s12  ;;  %p60_p5 = scmp.eq.s32.totalorder %s498_s17, 0 }
   0xd   : > { %s1034_s19 = smov (%p35_p0, %s33_s19), 0  ;;  %p859_p4 = por %p759_p1, %p54_p2 }
   0xe   : > { %p863_p6 = por %p60_p5, %p59_p3  ;;  %s101_s22 = ssub.s32 %s786_s15, %s1034_s19 }
   0xf   : > { %p102_p7 = scmp.eq.s32.totalorder %s101_s22, 0  ;;  %s104_s23 = sadd.s32 1, %s770_s11 }
  0x10   : > { %s1017_s21 = scalar_select %p863_p6, 1, 0 }
  0x11   : > { %s871_s24 = scalar_select %p102_p7, %s770_s11, %s104_s23  }
  0x12   : > { %p114_p8 = scmp.ne.s32.totalorder %s770_s11, %s766_s10  ;;  %p115_p9 = scmp.eq.s32.totalorder %s498_s17, 1 }
  0x13   : > { %p120_p10 = scmp.ne.s32.totalorder %s766_s10, %s762_s9  ;;  %p121_p11 = scmp.eq.s32.totalorder %s499_s18, 1 }
  0x14   : > { %p877_p12 = por %p115_p9, %p114_p8  ;;  %p544_p1 = scmp.lt.s32.totalorder %s790_s16, 2 }
  0x15   : > { %p882_p0 = por %p121_p11, %p120_p10  ;;  %s792_s27 = smov [#allocation5]  }
  0x16   : > { %s1018_s25 = scalar_select %p877_p12, 1, 0 }
  0x17   : > { %s1019_s26 = scalar_select %p882_p0, 1, 0 }
  0x18   : > { %s155_s28 = sshll.u32 %s792_s27, 4  ;;  %p889_p2 = pnand %p544_p1, %p859_p4  ;;  %s156_s28 = int_to_ptr.vmem [resolvable:$true] %s155_s28 }
  0x19   : > { %s629_s4 = scalar_lea.hbm %s1011_s0, 256 }
  0x1a   : > { %p630_p3 = scmp.ne.s32.totalorder %s1011_s0, %s629_s4  ;;  %p631_p5 = pneg %p889_p2 }
  0x1b   : > { %p636_p8 = scmp.lt.s32.totalorder %s629_s4, %s629_s4 }
  0x1c   : > { %p632_p7 = pnand %p631_p5, %p630_p3 }
  0x1e   : > { %p633_p4 = pneg %p632_p7 }
  0x20   : > { %p638_p9 = pnand %p636_p8, %p633_p4 }
  0x22   : > { %641 = shalt.err (!%p638_p9)
}
  0x23   : > { %s642_s7 = scalar_lea.vmem %s156_s28, 256  ;;  %s649_s8 = scalar_lea.vmem %s156_s28, 512 }
  0x24   : > { %p643_p10 = scmp.ne.s32.totalorder %s156_s28, %s642_s7  ;;  %p650_p13 = scmp.lt.s32.totalorder %s156_s28, %s156_s28 }
  0x25   : > { %p651_p0 = scmp.lt.s32.totalorder %s649_s8, %s642_s7 }
  0x26   : > { %p645_p11 = pnand %p643_p10, %p631_p5 }
  0x27   : > { %p652_p12 = por %p651_p0, %p650_p13 }
  0x28   : > { %p646_p1 = pneg %p645_p11 }
  0x2a   : > { %p653_p6 = pnand %p652_p12, %p646_p1 }
  0x2c   : > { %656 = shalt.err (!%p653_p6)
}
  0x2d   : > { %s793_s12 = smov 128   ;;  %s794_s17 = smov 8  }
  0x2e   : > { %536 = dma.hbm_to_vmem [thread:$0]  (!%p889_p2), %s1011_s0, 256, %s156_s28, [#allocation6], %s793_s12, %s793_s12, %s794_s17  }
  0x2f   : > { %p508_p3 = scmp.ge.s32.totalorder %s790_s16, 1  ;;  %p187_p7 = scmp.lt.s32.totalorder %s790_s16, 3 }
  0x30   : > { %s795_s23 = smov [#allocation8]   ;;  %s657_s4 = scalar_lea.hbm %s1012_s1, 256 }
  0x31   : > { %p914_p4 = pnand %p508_p3, %p187_p7  ;;  %s179_s27 = sshll.u32 %s795_s23, 4  ;;  %s180_s27 = int_to_ptr.vmem [resolvable:$true] %s179_s27 }
  0x32   : > { %p658_p6 = scmp.ne.s32.totalorder %s1012_s1, %s657_s4  ;;  %p664_p0 = scmp.lt.s32.totalorder %s657_s4, %s657_s4 }
  0x33   : > { %s1021_s22 = scalar_select %p914_p4, 1, 0 }
  0x34   : > { %p660_p12 = pnand %p658_p6, %p631_p5 }
  0x36   : > { %p661_p13 = pneg %p660_p12 }
  0x38   : > { %p666_p8 = pnand %p664_p0, %p661_p13 }
  0x3a   : > { %669 = shalt.err (!%p666_p8)
}
  0x3b   : > { %s670_s28 = scalar_lea.vmem %s180_s27, 256  ;;  %s677_s7 = scalar_lea.vmem %s180_s27, 512 }
  0x3c   : > { %p671_p9 = scmp.ne.s32.totalorder %s180_s27, %s670_s28  ;;  %p678_p1 = scmp.lt.s32.totalorder %s180_s27, %s180_s27 }
  0x3d   : > { %p679_p3 = scmp.lt.s32.totalorder %s677_s7, %s670_s28 }
  0x3e   : > { %p673_p10 = pnand %p671_p9, %p631_p5 }
  0x3f   : > { %p680_p7 = por %p679_p3, %p678_p1 }
  0x40   : > { %p674_p11 = pneg %p673_p10 }
  0x42   : > { %p681_p4 = pnand %p680_p7, %p674_p11 }
  0x44   : > { %684 = shalt.err (!%p681_p4)
}
  0x45   : > { %539 = dma.hbm_to_vmem [thread:$0]  (!%p889_p2), %s1012_s1, 256, %s180_s27, [#allocation9], %s793_s12, %s793_s12, %s794_s17  }
  0x46   : > { %p1022_p6 = scmp.ne.s32.totalorder %s1021_s22, 0 }
  0x47   : > { %s193_s20 = sand.u32 (!%p1022_p6), 1, %s778_s13   ;;  %p1023_p5 = scmp.ne.s32.totalorder (!%p1022_p6), %s1017_s21, 0 }
  0x48   : > { %191 = sbr.rel (%p1022_p6) target bundleno = 378 (0x17a), region = 28  ;;  %s509_s23 = sshll.u32 (!%p1022_p6), %s193_s20, 4 }
  0x49   : > { %s194_s30 = scalar_lea.sflag (!%p1022_p6), [#allocation6], %s193_s20  ;;  %s197_s3 = scalar_lea.vmem (!%p1022_p6), [#allocation5], %s509_s23 }
  0x4d   : > { %748 = dma.done.wait (%p1023_p5), %s194_s30, 256  }
  0x4e   : > { %750 = vsyncadd (%p1023_p5), %s194_s30, 4294967040  ;;  %s203_s29 = scalar_lea.sflag [#allocation9], %s193_s20  ;;  %s206_s4 = scalar_lea.vmem [#allocation8], %s509_s23 }
  0x4f   : > { %752 = dma.done.wait (%p1023_p5), %s203_s29, 256  }
  0x50   : > { %754 = vsyncadd (%p1023_p5), %s203_s29, 4294967040  ;;  %s229_s12 = sand.u32 1, %s766_s10   ;;  %v796_v0 = vmov 0.0   ;;  %v251_v1 = vld [vmem:[%s197_s3] sm:$0xff]  ;;  %v252_v2 = vld [vmem:[%s197_s3 + $0x8] sm:$0xff]  ;;  %p512_p2 = scmp.ge.s32.totalorder %s782_s14, 0 }
  0x51   : > { %s949_s17 = sshll.u32 %s229_s12, 3  ;;  %245 = vst [vmem:[#allocation2] sm:$0xff] %v796_v0  ;;  %246 = vst [vmem:[#allocation2 + $0x8] sm:$0xff] %v796_v0  ;;  %v255_v3 = vmul.f32 -10.0, %v251_v1  ;;  %v256_v4 = vmul.f32 -10.0, %v252_v2  ;;  %v253_v11 = vld [vmem:[%s206_s4] sm:$0xff] }
  0x52   : > { %247 = vst [vmem:[#allocation3 + $0x8] sm:$0xff] %v796_v0  ;;  %248 = vst [vmem:[#allocation3] sm:$0xff] %v796_v0  ;;  %v254_v12 = vld [vmem:[%s206_s4 + $0x8] sm:$0xff]  ;;  %s231_s21 = scalar_lea.vmem [#allocation10], %s949_s17 }
  0x53   : > { %249 = vst [vmem:[#allocation4 + $0x8] sm:$0xff] %v796_v0  ;;  %250 = vst [vmem:[#allocation4] sm:$0xff] %v796_v0  ;;  %v257_v5 = vmul.f32 1.442695, %v255_v3  ;;  %v259_v6 = vmul.f32 1.442695, %v256_v4 }
  0x55   : > { %621 = vpow2.f32 %v257_v5 }
  0x56   : > { %623 = vpow2.f32 %v259_v6 }
  0x62   : > { %v622_v7 = vpop.eup %621 }
  0x63   : > { %v624_v8 = vpop.eup %623  ;;  %v261_v9 = vadd.f32 1.0, %v622_v7 }
  0x64   : > { %v262_v10 = vadd.f32 1.0, %v624_v8 }
  0x65   : > { %625 = vrcp.f32 %v261_v9 }
  0x66   : > { %627 = vrcp.f32 %v262_v10 }
  0x70   : > { %271 = sbr.rel (%p512_p2) target bundleno = 123 (0x7b), region = 44 }
  0x72   : > { %v626_v13 = vpop.eup %625 }
  0x73   : > { %v628_v14 = vpop.eup %627  ;;  %v265_v15 = vmul.f32 %v626_v13, %v253_v11 }
  0x74   : > { %v266_v16 = vmul.f32 %v628_v14, %v254_v12 }
  0x75   : > { %v272_v17 = vld [vmem:[#allocation2] sm:$0xff]  ;;  %v273_v18 = vld [vmem:[#allocation2 + $0x8] sm:$0xff]  ;;  %v278_v19 = vld [vmem:[#allocation3 + $0x8] sm:$0xff] }
  0x76   : > { %v274_v20 = vadd.f32 %v272_v17, %v265_v15  ;;  %v275_v21 = vadd.f32 %v273_v18, %v266_v16  ;;  %v280_v22 = vadd.f32 %v626_v13, %v278_v19  ;;  %v279_v23 = vld [vmem:[#allocation3] sm:$0xff]  ;;  %v284_v24 = vld [vmem:[#allocation4 + $0x8] sm:$0xff]  ;;  %v285_v25 = vld [vmem:[#allocation4] sm:$0xff] }
  0x77   : > { %v281_v26 = vadd.f32 %v628_v14, %v279_v23  ;;  %v286_v27 = vadd.f32 %v284_v24, %v253_v11  ;;  %v287_v28 = vadd.f32 %v285_v25, %v254_v12 }
  0x78   : > { %276 = vst [vmem:[#allocation2] sm:$0xff] %v274_v20  ;;  %277 = vst [vmem:[#allocation2 + $0x8] sm:$0xff] %v275_v21 }
  0x79   : > { %282 = vst [vmem:[#allocation3 + $0x8] sm:$0xff] %v280_v22  ;;  %283 = vst [vmem:[#allocation3] sm:$0xff] %v281_v26 }
  0x7a   : > { %288 = vst [vmem:[#allocation4 + $0x8] sm:$0xff] %v286_v27  ;;  %289 = vst [vmem:[#allocation4] sm:$0xff] %v287_v28 }
  0x7b PF: > { %p513_p4 = scmp.lt.s32.totalorder %s782_s14, 0 }
  0x7c   : > { %s514_s22 = sshll.u32 (!%p513_p4), %s782_s14, 4 }
  0x7d   : > { %292 = sbr.rel (%p513_p4) target bundleno = 148 (0x94), region = 48 }
  0x82   : > { %v293_v29 = vlaneseq  ;;  %v299_v30 = vstv %s514_s22  ;;  %v308_v39 = vld [vmem:[#allocation2] sm:$0xff]  ;;  %v316_v40 = vld [vmem:[#allocation3 + $0x8] sm:$0xff]  ;;  %v324_v41 = vld [vmem:[#allocation4 + $0x8] sm:$0xff] }
  0x83   : > { %v309_v44 = vld [vmem:[#allocation2 + $0x8] sm:$0xff]  ;;  %v317_v46 = vld [vmem:[#allocation3] sm:$0xff]  ;;  %v325_v48 = vld [vmem:[#allocation4] sm:$0xff] }
  0x84   : > { %v294_v31 = vshrl.u32 %v293_v29, 7  ;;  %v297_v32 = vand.u32 127, %v293_v29 }
  0x86   : > { %v300_v33 = vadd.s32 %v299_v30, %v294_v31  ;;  %v295_v34 = vadd.s32 8, %v294_v31 }
  0x88   : > { %v302_v35 = vmul.u32 128, %v300_v33  ;;  %v301_v36 = vadd.s32 %v299_v30, %v295_v34 }
  0x8a   : > { %v304_v37 = vadd.s32 %v302_v35, %v297_v32  ;;  %v303_v38 = vmul.u32 128, %v301_v36 }
  0x8c   : > { %vm306_vm0 = vcmp.lt.s32.totalorder %v304_v37, 2048  ;;  %v305_v42 = vadd.s32 %v303_v38, %v297_v32 }
  0x8d   : > { %v310_v43 = vsel %vm306_vm0, %v265_v15, 0.0  ;;  %v318_v45 = vsel %vm306_vm0, %v626_v13, 0.0  ;;  %v326_v47 = vsel %vm306_vm0, %v253_v11, 0.0 }
  0x8e   : > { %v312_v49 = vadd.f32 %v310_v43, %v308_v39  ;;  %vm307_vm1 = vcmp.lt.s32.totalorder %v305_v42, 2048  ;;  %v320_v50 = vadd.f32 %v318_v45, %v316_v40  ;;  %v328_v51 = vadd.f32 %v326_v47, %v324_v41 }
  0x8f   : > { %v311_v52 = vsel %vm307_vm1, %v266_v16, 0.0  ;;  %v319_v53 = vsel %vm307_vm1, %v628_v14, 0.0  ;;  %v327_v54 = vsel %vm307_vm1, %v254_v12, 0.0 }
  0x90   : > { %314 = vst [vmem:[#allocation2] sm:$0xff] %v312_v49  ;;  %v313_v55 = vadd.f32 %v311_v52, %v309_v44  ;;  %322 = vst [vmem:[#allocation3 + $0x8] sm:$0xff] %v320_v50  ;;  %v321_v56 = vadd.f32 %v319_v53, %v317_v46  ;;  %v329_v57 = vadd.f32 %v327_v54, %v325_v48 }
  0x91   : > { %330 = vst [vmem:[#allocation4 + $0x8] sm:$0xff] %v328_v51 }
  0x92   : > { %315 = vst [vmem:[#allocation2 + $0x8] sm:$0xff] %v313_v55  ;;  %323 = vst [vmem:[#allocation3] sm:$0xff] %v321_v56 }
  0x93   : > { %331 = vst [vmem:[#allocation4] sm:$0xff] %v329_v57 }
  0x94 PF: > { %v371_v24 = vlaneseq  ;;  %s516_s6 = sshll.u32 %s782_s14, 7  ;;  %s397_s7 = sshll.u32 %s231_s21, 4  ;;  %s398_s7 = int_to_ptr.vmem [resolvable:$true] %s397_s7 }
  0x95   : > { %s961_s20 = scalar_lea.hbm %s1013_s2, %s516_s6  ;;  %s384_s14 = scalar_lea.sflag [#allocation7], %s229_s12 }
  0x96   : > { %v372_v25 = vshrl.u32 %v371_v24, 7  ;;  %s685_s23 = scalar_lea.vmem %s398_s7, 128  ;;  %p1024_p13 = scmp.ne.s32.totalorder %s1018_s25, 0 }
  0x97   : > { %v335_v60 = vld [vmem:[#allocation2] sm:$0xff]  ;;  %v347_v63 = vld [vmem:[#allocation3 + $0x8] sm:$0xff]  ;;  %p686_p12 = scmp.ne.s32.totalorder %s398_s7, %s685_s23  ;;  %s797_s30 = smov [#allocation10]  }
  0x98   : > { %v359_v58 = vld [vmem:[#allocation4 + $0x8] sm:$0xff]  ;;  %vm375_vm2 = vcmp.eq.s32.totalorder %v372_v25, 2  ;;  %vm374_vm3 = vcmp.eq.s32.totalorder %v372_v25, 1  ;;  %vm373_vm4 = vcmp.eq.s32.totalorder %v372_v25, 0  ;;  %s689_s3 = sshll.u32 %s797_s30, 4  ;;  %s690_s3 = int_to_ptr.vmem [resolvable:$false] %s689_s3 }
  0x99   : > { %v336_v62 = vld [vmem:[#allocation2 + $0x8] sm:$0xff]  ;;  %v348_v0 = vld [vmem:[#allocation3] sm:$0xff]  ;;  %p687_p0 = pnand %p686_p12, %p1024_p13  ;;  %s691_s29 = scalar_lea.vmem %s690_s3, 256 }
  0x9a   : > { %v360_v59 = vld [vmem:[#allocation4] sm:$0xff]  ;;  %v337_v1 = vadd.f32 %v336_v62, %v335_v60  ;;  %v349_v2 = vadd.f32 %v348_v0, %v347_v63  ;;  %p692_p9 = scmp.lt.s32.totalorder %s398_s7, %s690_s3  ;;  %p693_p10 = scmp.lt.s32.totalorder %s691_s29, %s685_s23 }
  0x9b   : > { %v361_v61 = vadd.f32 %v360_v59, %v359_v58  ;;  %p688_p8 = pneg %p687_p0 }
  0x9c   : > { %338 = vadd.xlane.f32.xlu0 %v337_v1  ;;  %p694_p11 = por %p693_p10, %p692_p9 }
  0x9d   : > { %362 = vadd.xlane.f32.xlu1 %v361_v61 }
  0x9e   : > { %p695_p1 = pnand %p694_p11, %p688_p8 }
  0xa0   : > { %350 = vadd.xlane.f32.xlu0 %v349_v2 }
 0x125   : > { %v339_v5 = vpop.xlane.xlu0 %338 }
 0x126   : > { %v363_v3 = vpop.xlane.xlu1 %362  ;;  %v340_v6 = vrot.slane %v339_v5, 4 }
 0x127   : > { %v364_v4 = vrot.slane %v363_v3, 4 }
 0x128   : > { %v341_v8 = vadd.f32 %v340_v6, %v339_v5 }
 0x129   : > { %v365_v7 = vadd.f32 %v364_v4, %v363_v3  ;;  %v351_v10 = vpop.xlane.xlu0 %350 }
 0x12a   : > { %v342_v11 = vrot.slane %v341_v8, 2  ;;  %v352_v12 = vrot.slane %v351_v10, 4 }
 0x12b   : > { %v366_v9 = vrot.slane %v365_v7, 2 }
 0x12c   : > { %v353_v13 = vadd.f32 %v352_v12, %v351_v10  ;;  %v343_v14 = vadd.f32 %v342_v11, %v341_v8 }
 0x12d   : > { %v367_v15 = vadd.f32 %v366_v9, %v365_v7 }
 0x12e   : > { %v354_v16 = vrot.slane %v353_v13, 2  ;;  %v344_v17 = vrot.slane %v343_v14, 1 }
 0x12f   : > { %v368_v20 = vrot.slane %v367_v15, 1 }
 0x130   : > { %v355_v18 = vadd.f32 %v354_v16, %v353_v13  ;;  %v345_v19 = vadd.f32 %v344_v17, %v343_v14 }
 0x131   : > { %v369_v23 = vadd.f32 %v368_v20, %v367_v15 }
 0x132   : > { %521 = vpush %v345_v19  ;;  %v356_v21 = vrot.slane %v355_v18, 1 }
 0x134   : > { %v357_v22 = vadd.f32 %v356_v21, %v355_v18 }
 0x136   : > { %523 = vpush %v357_v22 }
 0x137   : > { %525 = vpush %v369_v23 }
 0x163   : > { %s522_s27 = spop %521 }
 0x164   : > { %v380_v29 = vstv %s522_s27 }
 0x167   : > { %s524_s5 = spop %523 }
 0x168   : > { %v378_v26 = vstv %s524_s5  ;;  %s526_s28 = spop %525 }
 0x169   : > { %v376_v27 = vstv %s526_s28 }
 0x16a   : > { %v377_v28 = vsel %vm375_vm2, %v376_v27, 0.0 }
 0x16b   : > { %v379_v30 = vsel %vm374_vm3, %v378_v26, %v377_v28 }
 0x16c   : > { %v381_v31 = vsel %vm373_vm4, %v380_v29, %v379_v30 }
 0x16d   : > { %382 = vst [vmem:[%s231_s21] sm:$0xff] %v381_v31 }
 0x16e   : > { %698 = shalt.err (!%p695_p1)
}
 0x16f   : > { %s699_s4 = scalar_lea.hbm %s961_s20, 128  ;;  %s703_s21 = scalar_lea.hbm %s1013_s2, 256 }
 0x170   : > { %p700_p3 = scmp.ne.s32.totalorder %s961_s20, %s699_s4  ;;  %p704_p5 = scmp.lt.s32.totalorder %s961_s20, %s1013_s2 }
 0x171   : > { %p705_p2 = scmp.lt.s32.totalorder %s703_s21, %s699_s4 }
 0x172   : > { %p701_p7 = pnand %p700_p3, %p1024_p13 }
 0x173   : > { %p706_p4 = por %p705_p2, %p704_p5 }
 0x174   : > { %p702_p6 = pneg %p701_p7 }
 0x176   : > { %p707_p12 = pnand %p706_p4, %p702_p6 }
 0x178   : > { %710 = shalt.err (!%p707_p12)
}
 0x179   : > { %531 = dma.vmem_to_hbm [thread:$0]  (%p1024_p13), %s398_s7, 128, %s961_s20, %s384_s14  }
 0x17a PF: > { %s409_s5 = sand.u32 1, %s762_s9   ;;  %p1025_p0 = scmp.ne.s32.totalorder %s1019_s26, 0 }
 0x17b   : > { %p1026_p8 = scmp.ge.s32.totalorder %s790_s16, 2  ;;  %s410_s6 = scalar_lea.sflag [#allocation7], %s409_s5 }
 0x17d   : > { %p541_p9 = pnand %p1026_p8, %p1025_p0 }
 0x17f   : > { %p542_p10 = pneg %p541_p9 }
 0x181   : > { %756 = dma.done.wait (%p542_p10), %s410_s6, 128  }
 0x182   : > { %758 = vsyncadd (%p542_p10), %s410_s6, 4294967168  ;;  %s21_s16 = sadd.s32 1, %s790_s16   ;;  %s1027_s9 = smov %s766_s10 }
 0x183   : > { %p18_p11 = scmp.ge.s32.totalorder %s21_s16, 4   ;;  %s1028_s10 = smov %s770_s11 }
 0x184   : > { %s1029_s11 = smov %s871_s24  ;;  %s1030_s12 = smov %s778_s13 }
 0x185   : > { %s1001_s13 = smov 0   ;;  %s1031_s14 = smov %s786_s15 }
 0x186   : > { %s1032_s15 = smov %s1034_s19  ;;  %20 = sbr.rel (!%p18_p11) target bundleno = 9 (0x9), region = 102 }
 0x18b   :  { %415 = vsyncpa [#allocation6], 1 }
 0x18c   :  { %417 = vsyncpa [#allocation6 + $0x1], 1 }
 0x18d   :  { %418 = vsyncpa [#allocation9], 1 }
 0x18e   :  { %420 = vsyncpa [#allocation9 + $0x1], 1 }
 0x18f   :  { %421 = vsyncpa [#allocation7], 1 }
 0x190   :  { %423 = vsyncpa [#allocation7 + $0x1], 1 }

</bundles_post_ra>
